<compile_context>
chip_gen: v5e
topology: v5e:2x2
jax: 0.10.0
libtpu: 0.0.40
codegen_flags: <defaults>
</compile_context>

<pallas_src>
import jax
import jax.numpy as jnp
from jax.experimental import pallas as pl
from jax.experimental.pallas import tpu as pltpu


def _mlp_kernel(x_ref, w1_ref, b1_ref, w2_ref, b2_ref, o_ref):
    # x_ref : (bt, K)    VMEM  (K = F*P, lane-packed batch rows)
    # w1_ref: (K, H*P)   VMEM  block-diagonal first Linear weight
    # b1_ref: (1, H*P)   VMEM  tiled first Linear bias
    # w2_ref: (H*P, P)   VMEM  block-diagonal second Linear weight
    # b2_ref: (1,)       SMEM  second Linear bias (scalar)
    # o_ref : (bt, P)
    h = jnp.dot(x_ref[...], w1_ref[...], preferred_element_type=jnp.float32)
    h = jnp.maximum(h + b1_ref[...], 0.0)                    # bias + ReLU (VPU)
    y = jnp.dot(h, w2_ref[...], preferred_element_type=jnp.float32) + b2_ref[0]
    o_ref[...] = y.astype(o_ref.dtype)


def _round_up(v, m):
    return ((v + m - 1) // m) * m


def lights_forward(x, w1, b1, w2, b2, *, block_rows=16384, small_batch=1024):
    """Forward pass of `Lights`:  relu(x @ w1 + b1) @ w2 + b2.

    x: (B, F), w1: (F, H), b1: (1, H), w2: (H, 1), b2: (1, 1).  Weights are
    stored pre-transposed as (in, out), i.e. same math as PyTorch x @ W^T + b.
    Returns (B, 1).
    """
    B, F = x.shape
    H = w1.shape[1]
    dtype = x.dtype

    # ---- Lane packing: fold P consecutive batch rows into one 128-lane row.
    P = 1
    if F <= 64:
        P = max(1, 128 // F)
        while P > 1 and B % P:      # keep the reshape free (no padding copy)
            P //= 2
    K = F * P
    xp = x.reshape(B // P, K)
    R = B // P                                           # packed row count

    eye = jnp.eye(P, dtype=w1.dtype)
    w1p = jnp.kron(eye, w1)                              # (K, H*P) block-diag
    b1p = jnp.tile(jnp.reshape(b1, (1, H)), (1, P))      # (1, H*P)
    w2p = jnp.kron(eye, jnp.reshape(w2, (H, 1)))         # (H*P, P) block-diag
    b2s = jnp.reshape(b2, (1,))                          # (1,) SMEM scalar

    vmem = pl.BlockSpec(memory_space=pltpu.MemorySpace.VMEM)
    smem = pl.BlockSpec(memory_space=pltpu.MemorySpace.SMEM)

    if B <= small_batch:
        # Single-shot kernel: no grid -> no per-step pipeline machinery.
        out = pl.pallas_call(
            _mlp_kernel,
            out_shape=jax.ShapeDtypeStruct((R, P), dtype),
            in_specs=[vmem, vmem, vmem, vmem, smem],
            out_specs=vmem,
        )(xp, w1p, b1p, w2p, b2s)
        return out.reshape(B, 1)

    # ---- Large batch: stream big packed-row tiles through the pipeline.
    bp = max(8, (block_rows // P // 8) * 8)
    # Keep at least two grid steps so both v7x TensorCores get work.
    bp = min(bp, max(8, _round_up(pl.cdiv(R, 2), 8)))
    n_blocks = pl.cdiv(R, bp)     # last block may be partial; Pallas masks it

    out = pl.pallas_call(
        _mlp_kernel,
        out_shape=jax.ShapeDtypeStruct((R, P), dtype),
        grid=(n_blocks,),
        in_specs=[
            pl.BlockSpec((bp, K), lambda i: (i, 0)),      # streamed batch tiles
            pl.BlockSpec((K, H * P), lambda i: (0, 0)),   # VMEM-resident weight
            pl.BlockSpec((1, H * P), lambda i: (0, 0)),   # VMEM-resident bias
            pl.BlockSpec((H * P, P), lambda i: (0, 0)),   # VMEM-resident weight
            smem,                                         # scalar bias in SMEM
        ],
        out_specs=pl.BlockSpec((bp, P), lambda i: (i, 0)),
        compiler_params=pltpu.CompilerParams(
            dimension_semantics=("parallel",),            # shard across v7x TCs
            vmem_limit_bytes=32 * 1024 * 1024,            # explicit, v7x-safe
        ),
    )(xp, w1p, b1p, w2p, b2s)
    return out.reshape(B, 1)


def lights_reference(x, w1, b1, w2, b2):
    h = jnp.maximum(x @ w1 + b1, 0.0)
    return h @ w2 + b2


if __name__ == "__main__":
    # Shapes implied by the module: LazyLinear infers in_features from x.
    # batch=8, in_features=32, hidden=4 (first Linear), out=1 (second Linear).
    B, F, H = 8, 32, 4

    key = jax.random.PRNGKey(0)
    kx, kw1, kb1, kw2, kb2, kx2, kx3 = jax.random.split(key, 7)

    x = jax.random.normal(kx, (B, F), dtype=jnp.float32)
    w1 = jax.random.normal(kw1, (F, H), dtype=jnp.float32) * 0.1
    b1 = jax.random.normal(kb1, (1, H), dtype=jnp.float32) * 0.1
    w2 = jax.random.normal(kw2, (H, 1), dtype=jnp.float32) * 0.1
    b2 = jax.random.normal(kb2, (1, 1), dtype=jnp.float32) * 0.1

    # Small-batch (gridless, lane-packed) path.
    out = jax.block_until_ready(lights_forward(x, w1, b1, w2, b2))
    ref = lights_reference(x, w1, b1, w2, b2)
    assert out.shape == (B, 1)
    assert jnp.allclose(out, ref, atol=1e-5, rtol=1e-5)

    # Streaming path: ragged (non-multiple-of-block) batch, packed lanes.
    B2 = 2500
    x2 = jax.random.normal(kx2, (B2, F), dtype=jnp.float32)
    out2 = jax.block_until_ready(
        lights_forward(x2, w1, b1, w2, b2, small_batch=256))
    ref2 = lights_reference(x2, w1, b1, w2, b2)
    assert out2.shape == (B2, 1)
    assert jnp.allclose(out2, ref2, atol=1e-5, rtol=1e-5)

    # Streaming path where lane packing falls back to P=1 (odd batch size).
    B3 = 2501
    x3 = jax.random.normal(kx3, (B3, F), dtype=jnp.float32)
    out3 = jax.block_until_ready(
        lights_forward(x3, w1, b1, w2, b2, small_batch=256))
    ref3 = lights_reference(x3, w1, b1, w2, b2)
    assert out3.shape == (B3, 1)
    assert jnp.allclose(out3, ref3, atol=1e-5, rtol=1e-5)

    print("KERNEL_OK")
</pallas_src>

<mosaic_0001>
module attributes {stable_mosaic.version = 11 : i64} {
  func.func @_mlp_kernel(%arg0: memref<2x128xf32, #tpu.memory_space<vmem>>, %arg1: memref<128x16xf32, #tpu.memory_space<vmem>>, %arg2: memref<1x16xf32, #tpu.memory_space<vmem>>, %arg3: memref<16x4xf32, #tpu.memory_space<vmem>>, %arg4: memref<1xf32, #tpu.memory_space<smem>>, %arg5: memref<2x4xf32, #tpu.memory_space<vmem>>) attributes {dimension_semantics = [], scalar_prefetch = 0 : i64, scratch_operands = 0 : i64, tpu.core_type = #tpu.core_type<tc>} {
    %c0 = arith.constant 0 : index
    %c0_0 = arith.constant 0 : index
    %0 = vector.load %arg0[%c0, %c0_0] : memref<2x128xf32, #tpu.memory_space<vmem>>, vector<2x128xf32>
    %c0_1 = arith.constant 0 : index
    %c0_2 = arith.constant 0 : index
    %1 = vector.load %arg1[%c0_1, %c0_2] : memref<128x16xf32, #tpu.memory_space<vmem>>, vector<128x16xf32>
    %cst = arith.constant dense<0.000000e+00> : vector<2x16xf32>
    %2 = tpu.matmul %0, %1, %cst {dimension_numbers = #tpu.dot_dimension_numbers<[1], [0], [0], [1], [0, 0, 1, 1], [], []>} : vector<2x128xf32>, vector<128x16xf32>, vector<2x16xf32> -> vector<2x16xf32>
    %c0_3 = arith.constant 0 : index
    %c0_4 = arith.constant 0 : index
    %3 = vector.load %arg2[%c0_3, %c0_4] : memref<1x16xf32, #tpu.memory_space<vmem>>, vector<1x16xf32>
    %4 = vector.broadcast %3 : vector<1x16xf32> to vector<2x16xf32>
    %5 = arith.addf %2, %4 : vector<2x16xf32>
    %cst_5 = arith.constant 0.000000e+00 : f32
    %6 = vector.broadcast %cst_5 : f32 to vector<2x16xf32>
    %7 = arith.maximumf %5, %6 : vector<2x16xf32>
    %c0_6 = arith.constant 0 : index
    %c0_7 = arith.constant 0 : index
    %8 = vector.load %arg3[%c0_6, %c0_7] : memref<16x4xf32, #tpu.memory_space<vmem>>, vector<16x4xf32>
    %cst_8 = arith.constant dense<0.000000e+00> : vector<2x4xf32>
    %9 = tpu.matmul %7, %8, %cst_8 {dimension_numbers = #tpu.dot_dimension_numbers<[1], [0], [0], [1], [0, 0, 1, 1], [], []>} : vector<2x16xf32>, vector<16x4xf32>, vector<2x4xf32> -> vector<2x4xf32>
    %c0_9 = arith.constant 0 : index
    %10 = memref.load %arg4[%c0_9] : memref<1xf32, #tpu.memory_space<smem>>
    %11 = vector.broadcast %10 : f32 to vector<2x4xf32>
    %12 = arith.addf %9, %11 : vector<2x4xf32>
    %c0_10 = arith.constant 0 : index
    %c0_11 = arith.constant 0 : index
    %13 = vector.load %arg5[%c0_10, %c0_11] : memref<2x4xf32, #tpu.memory_space<vmem>>, vector<2x4xf32>
    tpu.vector_store %arg5[%c0_10, %c0_11], %12 {strides = array<i32>} : memref<2x4xf32, #tpu.memory_space<vmem>>, vector<2x4xf32>,
    return
  }
}

</mosaic_0001>

<bundles_post_ra>
// kernel: tpu_custom_call.1
= control target key start
LH: loop header
LB: loop body
LE: loop exit
PB: predicated region body
PF: predicated region fallthrough
CT: control target
= control target key end

     0   :  { %s236_s0 = inlined_call_operand.vmem [shape: f32[2,128], index: 0, kind: input, shape index: {}]   ;;  %s237_s1 = inlined_call_operand.vmem [shape: f32[128,16], index: 1, kind: input, shape index: {}]   ;;  %s238_s2 = inlined_call_operand.vmem [shape: f32[1,16], index: 2, kind: input, shape index: {}]   ;;  %s239_s3 = inlined_call_operand.vmem [shape: f32[16,4], index: 3, kind: input, shape index: {}]   ;;  %s240_s4 = inlined_call_operand.<no memory space> [shape: f32[1], index: 4, kind: input, shape index: {}]   ;;  %s241_s5 = inlined_call_operand.hbm [shape: f32[2,4], index: 5, kind: output, shape index: {}]  }
   0x1   :  { %v38_v0 = vld [vmem:[%s237_s1 + $0x78] sm:$0xff]  ;;  %v37_v1 = vld [vmem:[%s237_s1 + $0x70] sm:$0xff]  ;;  %v36_v2 = vld [vmem:[%s237_s1 + $0x68] sm:$0xff] }
   0x2   :  { %43 = vmatpush.msra.mxu0 %v38_v0  ;;  %v35_v3 = vld [vmem:[%s237_s1 + $0x60] sm:$0xff]  ;;  %v34_v4 = vld [vmem:[%s237_s1 + $0x58] sm:$0xff] }
   0x4   :  { %44 = vmatpush.msra.mxu0 %v37_v1 }
   0x6   :  { %45 = vmatpush.msra.mxu0 %v36_v2 }
   0x7   :  { %11 = vsyncpa [#allocation4], 0  ;;  %v33_v5 = vld [vmem:[%s237_s1 + $0x50] sm:$0xff]  ;;  %v32_v6 = vld [vmem:[%s237_s1 + $0x48] sm:$0xff]  ;;  %vm68_vm0 = vcmask 130048   ;;  %v67_v23 = vstv %s240_s4  ;;  %s139_s8 = smov [#allocation3]  }
   0x8   :  { %46 = vmatpush.msra.mxu0 %v35_v3  ;;  %v31_v7 = vld [vmem:[%s237_s1 + $0x40] sm:$0xff]  ;;  %v30_v8 = vld [vmem:[%s237_s1 + $0x38] sm:$0xff]  ;;  %v29_v9 = vld [vmem:[%s237_s1 + $0x30] sm:$0xff]  ;;  %s99_s9 = sshll.u32 %s139_s8, 4  ;;  %vm92_vm1 = vcmask 25600   ;;  %s100_s9 = int_to_ptr.vmem [resolvable:$true] %s99_s9 }
   0x9   :  { %v28_v10 = vld [vmem:[%s237_s1 + $0x28] sm:$0xff]  ;;  %v27_v11 = vld [vmem:[%s237_s1 + $0x20] sm:$0xff]  ;;  %v26_v12 = vld [vmem:[%s237_s1 + $0x18] sm:$0xff] }
   0xa   :  { %47 = vmatpush.msra.mxu0 %v34_v4  ;;  %v25_v13 = vld [vmem:[%s237_s1 + $0x10] sm:$0xff]  ;;  %v24_v14 = vld [vmem:[%s237_s1 + $0x8] sm:$0xff]  ;;  %v23_v15 = vld [vmem:[%s237_s1] sm:$0xff] }
   0xb   :  { %v22_v16 = vld [vmem:[%s236_s0] sm:$0x3]  ;;  %v65_v17 = vld [vmem:[%s239_s3 + $0x8] sm:$0xff] }
   0xc   :  { %48 = vmatpush.msra.mxu0 %v33_v5  ;;  %86 = vmatpush.msra.mxu1 %v65_v17  ;;  %v64_v18 = vld [vmem:[%s239_s3] sm:$0xff]  ;;  %s101_s3 = sshll.u32 %s241_s5, 4  ;;  %s102_s3 = int_to_ptr.hbm [resolvable:$true] %s101_s3 }
   0xd   :  { %v112_v19 = vld [vmem:[%s238_s2] ss:$0 sm:$0xff] }
   0xe   :  { %49 = vmatpush.msra.mxu0 %v32_v6  ;;  %87 = vmatpush.msra.mxu1 %v64_v18 }
  0x10   :  { %50 = vmatpush.msra.mxu0 %v31_v7 }
  0x12   :  { %51 = vmatpush.msra.mxu0 %v30_v8 }
  0x14   :  { %52 = vmatpush.msra.mxu0 %v29_v9 }
  0x16   :  { %53 = vmatpush.msra.mxu0 %v28_v10 }
  0x18   :  { %54 = vmatpush.msra.mxu0 %v27_v11 }
  0x1a   :  { %55 = vmatpush.msra.mxu0 %v26_v12 }
  0x1c   :  { %56 = vmatpush.msra.mxu0 %v25_v13 }
  0x1e   :  { %57 = vmatpush.msra.mxu0 %v24_v14 }
  0x20   :  { %58 = vmatpush.msra.mxu0 %v23_v15 }
  0x21   :  { %59 = vmatmul.f32.vlgmr.msra.gmra.mxu0 %v22_v16 }
  0x9e   :  { %v60_v20 = vpop.f32.mrf.mxu0 }
  0x9f   :  { %v61_v21 = vadd.f32 %v112_v19, %v60_v20 }
  0xa1   :  { %v63_v22 = vmax.f32 %v61_v21, 0.0 }
  0xa3   :  { %110 = vmatmul.msk.f32.vlgmr.msra.gmra.mxu1 %vm68_vm0, %v63_v22 }
 0x120   :  { %v89_v24 = vpop.f32.mrf.mxu1 }
 0x121   :  { %v90_v25 = vadd.f32 %v89_v24, %v67_v23 }
 0x123   :  { %93 = vst.msk [vmem:[#allocation3] sm:$0x3] %vm92_vm1, %v90_v25 }
 0x124   :  { %104 = dma.vmem_to_hbm [thread:$0]  %s100_s9, 32, %s102_s3, [#allocation4]  }
 0x125   :  { %137 = dma.done.wait [#allocation4], 32  }
 0x126   :  { %138 = vsyncadd [#allocation4], 4294967264 }
 0x127   :  { %109 = vsyncpa [#allocation4], 1 }

</bundles_post_ra>
